<compile_context>
chip_gen: v6e
topology: v6e:2x2x1
jax: 0.10.0
libtpu: 0.0.40
codegen_flags: <defaults>
</compile_context>

<pallas_src>
import jax
import jax.numpy as jnp
from jax.experimental import pallas as pl
from jax.experimental.pallas import tpu as pltpu


def se_kernel(x_ref, w1t_ref, b1_ref, w2_ref, b2_ref, o_ref):
    """One batch element per grid step.

    x_ref  : (1, C, HW)  input tile (channels on sublanes, spatial on lanes)
    w1t_ref: (C, S)      fc1 weight, pre-transposed (in, squeeze)
    b1_ref : (1, S)      fc1 bias
    w2_ref : (C, S)      fc2 weight (out, squeeze)
    b2_ref : (C, 1)      fc2 bias
    o_ref  : (1, C, HW)  output tile
    """
    x = x_ref[0]                                      # (C, HW)

    # Global average pool over spatial (lane/XLU reduction) -> (C, 1).
    # NOTE: correct only because the block spans the full HW extent; if HW is
    # ever tiled (large images / v7x VMEM budget), pooling must become a
    # separate accumulating pass.
    pooled = jnp.mean(x, axis=1, keepdims=True)

    # fc1 (1x1 conv): h[s] = sum_c w1[s,c] * pooled[c] + b1[s]     -> (1, S)
    # For these tiny widths (C=4, S=2) an elementwise-multiply + reduce is the
    # right tool; at production widths (C >= 128) switch to jnp.dot on the MXU.
    h = jnp.sum(w1t_ref[...] * pooled, axis=0, keepdims=True) + b1_ref[...]
    h = jnp.maximum(h, 0.0)                           # ReLU

    # fc2 (1x1 conv): s[c] = sum_s w2[c,s] * h[s] + b2[c]          -> (C, 1)
    s = jnp.sum(w2_ref[...] * h, axis=1, keepdims=True) + b2_ref[...]

    # Hardsigmoid: clip((x + 3) / 6, 0, 1)
    s = jnp.clip((s + 3.0) / 6.0, 0.0, 1.0)

    # Per-channel (per-sublane-row) scale broadcast over all spatial lanes.
    o_ref[...] = (s * x)[None].astype(o_ref.dtype)


def se_block(x_nchw, fc1_w, fc1_b, fc2_w, fc2_b):
    """x_nchw: (N, C, H, W); fc1_w: (S, C, 1, 1); fc1_b: (S,);
    fc2_w: (C, S, 1, 1); fc2_b: (C,). Returns (N, C, H, W)."""
    N, C, H, W = x_nchw.shape
    S = fc1_w.shape[0]
    HW = H * W

    # Glue: pure reshapes/views only -- no HBM transposes.
    x_k = x_nchw.reshape(N, C, HW)            # native NCHW layout, HW on lanes
    w1t_k = fc1_w.reshape(S, C).T             # (C, S)
    b1_k = fc1_b.reshape(1, S)
    w2_k = fc2_w.reshape(C, S)
    b2_k = fc2_b.reshape(C, 1)

    out = pl.pallas_call(
        se_kernel,
        out_shape=jax.ShapeDtypeStruct((N, C, HW), x_nchw.dtype),
        grid_spec=pltpu.PrefetchScalarGridSpec(
            num_scalar_prefetch=0,
            grid=(N,),
            in_specs=[
                pl.BlockSpec((1, C, HW), lambda n: (n, 0, 0)),
                pl.BlockSpec((C, S), lambda n: (0, 0)),
                pl.BlockSpec((1, S), lambda n: (0, 0)),
                pl.BlockSpec((C, S), lambda n: (0, 0)),
                pl.BlockSpec((C, 1), lambda n: (0, 0)),
            ],
            out_specs=pl.BlockSpec((1, C, HW), lambda n: (n, 0, 0)),
        ),
        compiler_params=pltpu.CompilerParams(
            dimension_semantics=("parallel",)),
    )(x_k, w1t_k, b1_k, w2_k, b2_k)

    return out.reshape(N, C, H, W)


def se_block_ref(x, fc1_w, fc1_b, fc2_w, fc2_b):
    """Pure-JAX reference mirroring the PyTorch module (NCHW)."""
    N, C, H, W = x.shape
    S = fc1_w.shape[0]
    pooled = jnp.mean(x, axis=(2, 3))                               # (N, C)
    h = pooled @ fc1_w.reshape(S, C).T + fc1_b                      # (N, S)
    h = jnp.maximum(h, 0.0)
    s = h @ fc2_w.reshape(C, S).T + fc2_b                           # (N, C)
    s = jnp.clip((s + 3.0) / 6.0, 0.0, 1.0)
    return s[:, :, None, None] * x


if __name__ == "__main__":
    # Module config: SEBlock(in_channel=4, squeeze_channel=2)
    N, C, H, W = 2, 4, 16, 16
    S = 2

    key = jax.random.PRNGKey(0)
    kx, k1, k2, k3, k4 = jax.random.split(key, 5)

    x = jax.random.normal(kx, (N, C, H, W), dtype=jnp.float32)
    # Deterministic synthetic parameters (shapes match nn.Conv2d(.., 1)).
    fc1_w = 0.3 * jax.random.normal(k1, (S, C, 1, 1), dtype=jnp.float32)
    fc1_b = 0.1 * jax.random.normal(k2, (S,), dtype=jnp.float32)
    fc2_w = 0.3 * jax.random.normal(k3, (C, S, 1, 1), dtype=jnp.float32)
    fc2_b = 0.1 * jax.random.normal(k4, (C,), dtype=jnp.float32)

    out = se_block(x, fc1_w, fc1_b, fc2_w, fc2_b)
    out = jax.block_until_ready(out)

    ref = se_block_ref(x, fc1_w, fc1_b, fc2_w, fc2_b)
    assert out.shape == (N, C, H, W)
    assert jnp.allclose(out, ref, atol=1e-5, rtol=1e-5), "mismatch vs reference"

    print("KERNEL_OK")
</pallas_src>

<mosaic_0001>
module attributes {stable_mosaic.version = 11 : i64} {
  func.func @se_kernel(%arg0: i32, %arg1: memref<1x4x256xf32, #tpu.memory_space<vmem>>, %arg2: memref<4x2xf32, #tpu.memory_space<vmem>>, %arg3: memref<1x2xf32, #tpu.memory_space<vmem>>, %arg4: memref<4x2xf32, #tpu.memory_space<vmem>>, %arg5: memref<4x1xf32, #tpu.memory_space<vmem>>, %arg6: memref<1x4x256xf32, #tpu.memory_space<vmem>>) attributes {dimension_semantics = [#tpu.dimension_semantics<parallel>], iteration_bounds = array<i64: 2>, scalar_prefetch = 0 : i64, scratch_operands = 0 : i64, tpu.core_type = #tpu.core_type<tc>, window_params = [{transform_indices = @transform_0, window_bounds = array<i64: 1, 4, 256>}, {pipeline_mode = #tpu.pipeline_mode<synchronous>, transform_indices = @transform_1, window_bounds = array<i64: 4, 2>}, {pipeline_mode = #tpu.pipeline_mode<synchronous>, transform_indices = @transform_2, window_bounds = array<i64: 1, 2>}, {pipeline_mode = #tpu.pipeline_mode<synchronous>, transform_indices = @transform_3, window_bounds = array<i64: 4, 2>}, {pipeline_mode = #tpu.pipeline_mode<synchronous>, transform_indices = @transform_4, window_bounds = array<i64: 4, 1>}, {transform_indices = @transform_5, window_bounds = array<i64: 1, 4, 256>}]} {
    %c0 = arith.constant 0 : index
    %c0_0 = arith.constant 0 : index
    %c0_1 = arith.constant 0 : index
    %0 = vector.load %arg1[%c0, %c0_0, %c0_1] : memref<1x4x256xf32, #tpu.memory_space<vmem>>, vector<1x4x256xf32>
    %1 = vector.shape_cast %0 : vector<1x4x256xf32> to vector<4x256xf32>
    %cst = arith.constant dense<0.000000e+00> : vector<4xf32>
    %2 = vector.multi_reduction <add>, %1, %cst [1] : vector<4x256xf32> to vector<4xf32>
    %3 = vector.shape_cast %2 : vector<4xf32> to vector<4x1xf32>
    %cst_2 = arith.constant 2.560000e+02 : f32
    %4 = vector.broadcast %cst_2 : f32 to vector<4x1xf32>
    %5 = arith.divf %3, %4 : vector<4x1xf32>
    %c0_3 = arith.constant 0 : index
    %c0_4 = arith.constant 0 : index
    %6 = vector.load %arg2[%c0_3, %c0_4] : memref<4x2xf32, #tpu.memory_space<vmem>>, vector<4x2xf32>
    %7 = vector.broadcast %5 : vector<4x1xf32> to vector<4x2xf32>
    %8 = arith.mulf %6, %7 : vector<4x2xf32>
    %cst_5 = arith.constant dense<0.000000e+00> : vector<2xf32>
    %9 = vector.multi_reduction <add>, %8, %cst_5 [0] : vector<4x2xf32> to vector<2xf32>
    %10 = vector.shape_cast %9 : vector<2xf32> to vector<1x2xf32>
    %c0_6 = arith.constant 0 : index
    %c0_7 = arith.constant 0 : index
    %11 = vector.load %arg3[%c0_6, %c0_7] : memref<1x2xf32, #tpu.memory_space<vmem>>, vector<1x2xf32>
    %12 = arith.addf %10, %11 : vector<1x2xf32>
    %cst_8 = arith.constant 0.000000e+00 : f32
    %13 = vector.broadcast %cst_8 : f32 to vector<1x2xf32>
    %14 = arith.maximumf %12, %13 : vector<1x2xf32>
    %c0_9 = arith.constant 0 : index
    %c0_10 = arith.constant 0 : index
    %15 = vector.load %arg4[%c0_9, %c0_10] : memref<4x2xf32, #tpu.memory_space<vmem>>, vector<4x2xf32>
    %16 = vector.broadcast %14 : vector<1x2xf32> to vector<4x2xf32>
    %17 = arith.mulf %15, %16 : vector<4x2xf32>
    %cst_11 = arith.constant dense<0.000000e+00> : vector<4xf32>
    %18 = vector.multi_reduction <add>, %17, %cst_11 [1] : vector<4x2xf32> to vector<4xf32>
    %19 = vector.shape_cast %18 : vector<4xf32> to vector<4x1xf32>
    %c0_12 = arith.constant 0 : index
    %c0_13 = arith.constant 0 : index
    %20 = vector.load %arg5[%c0_12, %c0_13] : memref<4x1xf32, #tpu.memory_space<vmem>>, vector<4x1xf32>
    %21 = arith.addf %19, %20 : vector<4x1xf32>
    %cst_14 = arith.constant 3.000000e+00 : f32
    %22 = vector.broadcast %cst_14 : f32 to vector<4x1xf32>
    %23 = arith.addf %21, %22 : vector<4x1xf32>
    %cst_15 = arith.constant 6.000000e+00 : f32
    %24 = vector.broadcast %cst_15 : f32 to vector<4x1xf32>
    %25 = arith.divf %23, %24 : vector<4x1xf32>
    %cst_16 = arith.constant 0.000000e+00 : f32
    %cst_17 = arith.constant 1.000000e+00 : f32
    %26 = vector.broadcast %cst_16 : f32 to vector<4x1xf32>
    %27 = arith.maximumf %26, %25 : vector<4x1xf32>
    %28 = vector.broadcast %cst_17 : f32 to vector<4x1xf32>
    %29 = arith.minimumf %28, %27 : vector<4x1xf32>
    %30 = vector.broadcast %29 : vector<4x1xf32> to vector<4x256xf32>
    %31 = arith.mulf %30, %1 : vector<4x256xf32>
    %32 = vector.shape_cast %31 : vector<4x256xf32> to vector<1x4x256xf32>
    %c0_18 = arith.constant 0 : index
    %c0_19 = arith.constant 0 : index
    %c0_20 = arith.constant 0 : index
    %33 = vector.load %arg6[%c0_18, %c0_19, %c0_20] : memref<1x4x256xf32, #tpu.memory_space<vmem>>, vector<1x4x256xf32>
    tpu.vector_store %arg6[%c0_18, %c0_19, %c0_20], %32 {strides = array<i32>} : memref<1x4x256xf32, #tpu.memory_space<vmem>>, vector<1x4x256xf32>,
    return
  }
  func.func @transform_0(%arg0: i32) -> (i32, i32, i32) {
    %c0_i32 = arith.constant 0 : i32
    %c0_i32_0 = arith.constant 0 : i32
    %c0_i32_1 = arith.constant 0 : i32
    return %arg0, %c0_i32, %c0_i32_0 : i32, i32, i32
  }
  func.func @transform_1(%arg0: i32) -> (i32, i32) {
    %c0_i32 = arith.constant 0 : i32
    %c0_i32_0 = arith.constant 0 : i32
    %c0_i32_1 = arith.constant 0 : i32
    return %c0_i32, %c0_i32_0 : i32, i32
  }
  func.func @transform_2(%arg0: i32) -> (i32, i32) {
    %c0_i32 = arith.constant 0 : i32
    %c0_i32_0 = arith.constant 0 : i32
    %c0_i32_1 = arith.constant 0 : i32
    return %c0_i32, %c0_i32_0 : i32, i32
  }
  func.func @transform_3(%arg0: i32) -> (i32, i32) {
    %c0_i32 = arith.constant 0 : i32
    %c0_i32_0 = arith.constant 0 : i32
    %c0_i32_1 = arith.constant 0 : i32
    return %c0_i32, %c0_i32_0 : i32, i32
  }
  func.func @transform_4(%arg0: i32) -> (i32, i32) {
    %c0_i32 = arith.constant 0 : i32
    %c0_i32_0 = arith.constant 0 : i32
    %c0_i32_1 = arith.constant 0 : i32
    return %c0_i32, %c0_i32_0 : i32, i32
  }
  func.func @transform_5(%arg0: i32) -> (i32, i32, i32) {
    %c0_i32 = arith.constant 0 : i32
    %c0_i32_0 = arith.constant 0 : i32
    %c0_i32_1 = arith.constant 0 : i32
    return %arg0, %c0_i32, %c0_i32_0 : i32, i32, i32
  }
}

</mosaic_0001>

<bundles_post_ra>
// kernel: tpu_custom_call.1
= control target key start
LH: loop header
LB: loop body
LE: loop exit
PB: predicated region body
PF: predicated region fallthrough
CT: control target
= control target key end

     0   :  { %10 = vsyncpa [#allocation3], 0  ;;  %s602_s0 = inlined_call_operand.vmem [shape: f32[2,4,256], index: 0, kind: input, shape index: {}]   ;;  %s603_s1 = inlined_call_operand.vmem [shape: f32[4,2], index: 1, kind: input, shape index: {}]   ;;  %s604_s2 = inlined_call_operand.vmem [shape: f32[1,2], index: 2, kind: input, shape index: {}]   ;;  %s605_s3 = inlined_call_operand.vmem [shape: f32[4,2], index: 3, kind: input, shape index: {}]   ;;  %s606_s4 = inlined_call_operand.vmem [shape: f32[4,1], index: 4, kind: input, shape index: {}]   ;;  %s607_s5 = inlined_call_operand.hbm [shape: f32[2,4,256], index: 5, kind: output, shape index: {}]  }
   0x1   :  { %12 = vsyncpa [#allocation3 + $0x1], 0  ;;  %s501_s18 = smov 0   ;;  %s503_s19 = smov 0  }
   0x2   :  { %s505_s20 = smov 0   ;;  %s507_s21 = smov 0  }
   0x3 LB: > { %s522_s22 = sadd.s32 4294967295, %s467_s21   ;;  %s350_s23 = sadd.s32 4294967294, %s467_s21   ;;  %s467_s21 = sphi %s507_s21, %s613_s21   ;;  %s463_s20 = sphi %s505_s20, %s612_s20   ;;  %s459_s19 = sphi %s503_s19, %s611_s19   ;;  %s455_s18 = sphi %s501_s18, %s610_s18  }
   0x4   : > { %s526_s24 = sadd.s32 1, %s467_s21   ;;  %s135_s25 = sadd.s32 1, %s463_s20 }
   0x5   : > { %s132_s26 = ssub.s32 %s467_s21, %s526_s24  ;;  %p145_p0 = scmp.ne.s32.totalorder %s463_s20, %s459_s19 }
   0x6   : > { %p133_p1 = scmp.eq.s32.totalorder %s132_s26, 0  ;;  %p146_p2 = scmp.eq.s32.totalorder %s522_s22, 1 }
   0x7   : > { %p151_p3 = scmp.ne.s32.totalorder %s459_s19, %s455_s18  ;;  %p152_p4 = scmp.eq.s32.totalorder %s350_s23, 1 }
   0x8   : > { %s537_s27 = scalar_select %p133_p1, %s463_s20, %s135_s25  }
   0x9   : > { %p539_p5 = por %p146_p2, %p145_p0  ;;  %p543_p6 = por %p152_p4, %p151_p3 }
   0xa   : > { %p353_p7 = scmp.ge.s32.totalorder %s467_s21, 1  ;;  %p190_p8 = scmp.lt.s32.totalorder %s467_s21, 3 }
   0xc   : > { %p191_p9 = pnand %p353_p7, %p190_p8 }
   0xd   : > { %p218_p10 = scmp.lt.s32.totalorder (!%p191_p9), %s522_s22, 1  ;;  %s215_s23 = sand.u32 (!%p191_p9), 1, %s459_s19  }
   0xe   : > { %194 = sbr.rel (%p191_p9) target bundleno = 482 (0x1e2), region = 40  ;;  %s354_s25 = sshll.u32 (!%p191_p9), %s215_s23, 3 }
   0xf   : > { %s363_s26 = sshll.u32 (!%p191_p9), %s522_s22, 7  ;;  %s277_s10 = scalar_lea.sflag (!%p191_p9), [#allocation3], %s215_s23 }
  0x10   : > { %s470_s12 = smov (!%p191_p9), [#allocation2]  }
  0x11   : > { %s411_s13 = sshll.u32 (!%p191_p9), %s470_s12, 4  ;;  %s412_s13 = int_to_ptr.vmem [resolvable:$false] %s411_s13 }
  0x13   : > { %s219_s30 = scalar_select %p218_p10, %s522_s22, 1  ;;  %vm227_vm0 = vcmask 1043456   ;;  %v235_v5 = vld [vmem:[%s603_s1] sm:$0xf]  ;;  %vm237_vm1 = vcmask 11264   ;;  %v249_v13 = vlaneseq  ;;  %v469_v26 = vmov 0  }
  0x14   : > { %v245_v17 = vld [vmem:[%s604_s2] sm:$0x1]  ;;  %404 = vset.pattern.permute.xlu1 %v469_v26  ;;  %405 = vset.pattern.permute.xlu0 %v469_v26  ;;  %s413_s22 = scalar_lea.vmem %s412_s13, 256 }
  0x15   : > { %s362_s6 = sshll.u32 %s219_s30, 3  ;;  %v250_v16 = vshrl.u32 %v249_v13, 7  ;;  %v248_v22 = vld [vmem:[%s605_s3] sm:$0xf]  ;;  %s217_s30 = scalar_lea.vmem [#allocation2], %s354_s25 }
  0x16   : > { %s222_s9 = scalar_lea.vmem %s602_s0, %s362_s6  ;;  %v257_v27 = vld [vmem:[%s606_s4] sm:$0xf]  ;;  %s291_s6 = sshll.u32 %s217_s30, 4  ;;  %s292_s6 = int_to_ptr.vmem [resolvable:$true] %s291_s6 }
  0x17   : > { %v223_v0 = vld [vmem:[%s222_s9] sm:$0xff]  ;;  %v251_v20 = vsub.s32 0, %v250_v16  ;;  %s289_s9 = scalar_lea.hbm %s607_s5, %s363_s26  ;;  %s407_s11 = scalar_lea.vmem %s292_s6, 128 }
  0x18   : > { %v225_v1 = vcombine.high %v223_v0, %v223_v0  ;;  %v228_v2 = vsel %vm227_vm0, %v223_v0, 0.0  ;;  %p408_p11 = scmp.ne.s32.totalorder %s292_s6, %s407_s11  ;;  %p414_p0 = scmp.lt.s32.totalorder %s292_s6, %s412_s13 }
  0x19   : > { %p415_p1 = scmp.lt.s32.totalorder %s413_s22, %s407_s11 }
  0x1a   : > { %v229_v3 = vsel %vm227_vm0, %v225_v1, 0.0  ;;  %p409_p12 = pnand %p408_p11, %p539_p5 }
  0x1b   : > { %v230_v4 = vadd.f32 %v229_v3, %v228_v2  ;;  %p416_p2 = por %p415_p1, %p414_p0 }
  0x1c   : > { %p410_p13 = pneg %p409_p12 }
  0x1d   : > { %231 = vadd.xlane.f32.xlu0 %v230_v4 }
  0x1e   : > { %p417_p3 = pnand %p416_p2, %p410_p13 }
  0xa6   : > { %v232_v6 = vpop.xlane.xlu0 %231 }
  0xa7   : > { %v234_v7 = vmul.f32 0.00390625, %v232_v6 }
  0xa9   : > { %v236_v8 = vmul.f32 %v235_v5, %v234_v7 }
  0xab   : > { %v238_v9 = vsel %vm237_vm1, %v236_v8, 0.0 }
  0xac   : > { %v239_v10 = vrot.slane %v238_v9, 4 }
  0xae   : > { %v240_v11 = vadd.f32 %v239_v10, %v238_v9 }
  0xb0   : > { %v241_v12 = vrot.slane %v240_v11, 2 }
  0xb2   : > { %v242_v14 = vadd.f32 %v241_v12, %v240_v11 }
  0xb4   : > { %v243_v15 = vrot.slane %v242_v14, 1 }
  0xb6   : > { %v244_v18 = vadd.f32 %v243_v15, %v242_v14 }
  0xb8   : > { %v246_v19 = vadd.f32 %v245_v17, %v244_v18 }
  0xba   : > { %v247_v21 = vmax.f32 %v246_v19, 0.0 }
  0xbc   : > { %v252_v23 = vrot.slane %v247_v21, %v251_v20 }
  0xbe   : > { %v253_v24 = vmul.f32 %v252_v23, %v248_v22 }
  0xc0   : > { %v254_v25 = vsel %vm237_vm1, %v253_v24, 0.0 }
  0xc1   : > { %255 = vadd.xlane.f32.xlu0 %v254_v25 }
 0x14a   : > { %v256_v28 = vpop.xlane.xlu0 %255 }
 0x14b   : > { %v258_v29 = vadd.f32 %v257_v27, %v256_v28 }
 0x14d   : > { %v259_v30 = vadd.f32 3.0, %v258_v29 }
 0x14f   : > { %v261_v31 = vmul.f32 0.16666667, %v259_v30 }
 0x151   : > { %v262_v32 = vmax.f32 %v261_v31, 0.0 }
 0x153   : > { %v263_v33 = vmin.f32 %v262_v32, 1.0 }
 0x155   : > { %266 = vperm.xlu1 %404, %v263_v33  }
 0x1d0   : > { %v267_v34 = vpop.permute.xlu1 %266 }
 0x1d1   : > { %v269_v35 = vmul.f32 %v267_v34, %v223_v0  ;;  %v270_v36 = vmul.f32 %v267_v34, %v225_v1 }
 0x1d3   : > { %v273_v37 = vcombine.low %v269_v35, %v270_v36 }
 0x1d5   : > { %275 = vst [vmem:[%s217_s30] sm:$0xff] %v273_v37 }
 0x1d6   : > { %420 = shalt.err (!%p417_p3)
}
 0x1d7   : > { %s421_s14 = scalar_lea.hbm %s289_s9, 128  ;;  %s425_s17 = scalar_lea.hbm %s607_s5, 256 }
 0x1d8   : > { %p422_p4 = scmp.ne.s32.totalorder %s289_s9, %s421_s14  ;;  %p426_p9 = scmp.lt.s32.totalorder %s289_s9, %s607_s5 }
 0x1d9   : > { %p427_p10 = scmp.lt.s32.totalorder %s425_s17, %s421_s14 }
 0x1da   : > { %p423_p7 = pnand %p422_p4, %p539_p5 }
 0x1db   : > { %p428_p11 = por %p427_p10, %p426_p9 }
 0x1dc   : > { %p424_p8 = pneg %p423_p7 }
 0x1de   : > { %p429_p12 = pnand %p428_p11, %p424_p8 }
 0x1e0   : > { %432 = shalt.err (!%p429_p12)
}
 0x1e1   : > { %364 = dma.vmem_to_hbm [thread:$0]  (%p539_p5), %s292_s6, 128, %s289_s9, %s277_s10  }
 0x1e2 PF: > { %p370_p13 = scmp.ge.s32.totalorder %s467_s21, 2  ;;  %s303_s26 = sand.u32 1, %s455_s18  }
 0x1e3   : > { %s304_s30 = scalar_lea.sflag [#allocation3], %s303_s26 }
 0x1e4   : > { %p367_p0 = pnand %p370_p13, %p543_p6 }
 0x1e6   : > { %p368_p1 = pneg %p367_p0 }
 0x1e8   : > { %450 = dma.done.wait (%p368_p1), %s304_s30, 128  }
 0x1e9   : > { %452 = vsyncadd (%p368_p1), %s304_s30, 4294967168  ;;  %p15_p2 = scmp.ge.s32.totalorder %s526_s24, 4   ;;  %s610_s18 = smov %s459_s19 }
 0x1ea   : > { %s611_s19 = smov %s463_s20  ;;  %s612_s20 = smov %s537_s27 }
 0x1eb   : > { %s613_s21 = smov %s526_s24  ;;  %17 = sbr.rel (!%p15_p2) target bundleno = 3 (0x3), region = 75 }
 0x1f0   :  { %309 = vsyncpa [#allocation3], 1 }
 0x1f1   :  { %311 = vsyncpa [#allocation3 + $0x1], 1 }

</bundles_post_ra>
